<compile_context>
chip_gen: v5e
topology: v5e:2x2
jax: 0.10.0
libtpu: 0.0.40
codegen_flags: <defaults>
</compile_context>

<pallas_src>
import functools

import jax
import jax.numpy as jnp
from jax.experimental import pallas as pl
from jax.experimental.pallas import tpu as pltpu

LATENT_SIZE = 29
HIDDEN = 64
IN_DIM = LATENT_SIZE + 3        # 32
DIMS = [IN_DIM, HIDDEN, HIDDEN, 1]
SOFTPLUS_BETA = 1.0
SOFTPLUS_THRESHOLD = 20.0       # matches torch.nn.Softplus default
MAX_TILE = 2048                 # sweet spot per measured Pallas tiling data


def _softplus(x, beta=SOFTPLUS_BETA):
    # torch.nn.Softplus: log(1 + exp(beta*x)) / beta, linear above threshold.
    # Threshold branch kept so large pre-activations stay exact in bf16 too.
    bx = beta * x
    return jnp.where(bx > SOFTPLUS_THRESHOLD, x, jnp.log1p(jnp.exp(bx)) / beta)


def _act_dtype_for_device():
    """bf16 softplus only where the VPU/EUP natively support bf16 (v6e/v7x)."""
    try:
        kind = jax.devices()[0].device_kind.lower()
    except Exception:  # no device info -> conservative
        return jnp.float32
    if "v6" in kind or "v7" in kind or "tpu7" in kind:
        return jnp.bfloat16
    return jnp.float32


def _default_tile(n):
    """Largest 128-aligned tile up to MAX_TILE (don't over-pad tiny batches)."""
    n_aligned = ((max(int(n), 1) + 127) // 128) * 128
    return int(min(MAX_TILE, n_aligned))


def mlp_kernel(x_ref, w0_ref, b0_ref, w1_ref, b1_ref, w2t_ref, b2_ref, o_ref,
               *, act_dtype):
    """Fused 3-layer MLP.  All matmuls hit the MXU with f32 accumulation.
    Softplus runs in `act_dtype` (bf16 on v6e/v7x, f32 elsewhere)."""
    x = x_ref[...]                                            # (tile, 32)

    h = jnp.dot(x, w0_ref[...], preferred_element_type=jnp.float32) + b0_ref[...]
    h = _softplus(h.astype(act_dtype))                        # (tile, 64)

    h = jnp.dot(h, w1_ref[...], preferred_element_type=jnp.float32) + b1_ref[...]
    h = _softplus(h.astype(act_dtype))                        # (tile, 64)

    # Last layer computed transposed so the result is lane-dense:
    #   (1, 64) . (tile, 64)^T -> (1, tile)   (avoids (tile,1) masked stores)
    o = jax.lax.dot_general(
        w2t_ref[...], h, (((1,), (1,)), ((), ())),
        preferred_element_type=jnp.float32) + b2_ref[...]
    o_ref[...] = o.astype(o_ref.dtype)                        # (1, tile)


@functools.partial(jax.jit, static_argnames=("tile", "act_dtype", "io_dtype"))
def mlp_forward(x, params, *, tile=None, act_dtype=None, io_dtype=jnp.bfloat16):
    """x: (N, IN_DIM); params: w{0,1,2} as (in,out) f32, b{0,1,2} as (1,out)."""
    N, D = x.shape
    assert D == IN_DIM
    if act_dtype is None:
        act_dtype = _act_dtype_for_device()
    if tile is None:
        tile = _default_tile(N)
    assert tile % 128 == 0, "tile must be a multiple of 128 (lane-dense out)"

    n_tiles = pl.cdiv(N, tile)
    n_pad = n_tiles * tile
    if n_pad != N:                                   # pad batch to tile multiple
        x = jnp.pad(x, ((0, n_pad - N), (0, 0)))

    # bf16 input rows (+ first-layer weights) halve the dominant HBM traffic.
    x = x.astype(io_dtype)
    w0 = params["w0"].astype(io_dtype)
    w1 = params["w1"].astype(act_dtype)
    w2t = params["w2"].T.astype(act_dtype)           # (1, HIDDEN)
    b0 = params["b0"].astype(jnp.float32)
    b1 = params["b1"].astype(jnp.float32)
    b2 = params["b2"].astype(jnp.float32)

    # Weights/biases: constant index_map -> DMA'd once, stay resident in VMEM.
    full = lambda a: pl.BlockSpec(a.shape, lambda i: (0, 0))

    out = pl.pallas_call(
        functools.partial(mlp_kernel, act_dtype=act_dtype),
        out_shape=jax.ShapeDtypeStruct((1, n_pad), jnp.float32),
        grid_spec=pltpu.PrefetchScalarGridSpec(
            num_scalar_prefetch=0,
            grid=(n_tiles,),
            in_specs=[
                pl.BlockSpec((tile, IN_DIM), lambda i: (i, 0)),   # x rows
                full(w0), full(b0),                                # lin0
                full(w1), full(b1),                                # lin1
                full(w2t), full(b2),                               # lin2
            ],
            # Lane-dense output slab: each step writes a full (1, tile) slice.
            out_specs=pl.BlockSpec((1, tile), lambda i: (0, i)),
        ),
        compiler_params=pltpu.CompilerParams(
            dimension_semantics=("parallel",)),
        # VMEM at tile=2048: ~0.25 MB double-buffered x + ~0.5 MB activations
        # -> far under every generation's scoped limit, no vmem override needed.
    )(x, w0, b0, w1, b1, w2t, b2)

    return out.reshape(n_pad, 1)[:N]


def init_params(key):
    """Deterministic init mimicking nn.Linear default (uniform +-1/sqrt(fan_in)).
    Weights stored transposed as (in_dim, out_dim), biases as (1, out_dim)."""
    params = {}
    ks = jax.random.split(key, 6)
    layer_dims = list(zip(DIMS[:-1], DIMS[1:]))   # [(32,64),(64,64),(64,1)]
    for li, (din, dout) in enumerate(layer_dims):
        bound = 1.0 / jnp.sqrt(jnp.float32(din))
        w = jax.random.uniform(ks[2 * li], (din, dout), jnp.float32, -bound, bound)
        b = jax.random.uniform(ks[2 * li + 1], (1, dout), jnp.float32, -bound, bound)
        params[f"w{li}"] = w
        params[f"b{li}"] = b
    return params


def mlp_reference(x, params, *, io_dtype=jnp.bfloat16, act_dtype=jnp.float32):
    """Pure-JAX reference with the same dtype flow as the kernel."""
    h = jnp.dot(x.astype(io_dtype), params["w0"].astype(io_dtype),
                preferred_element_type=jnp.float32) + params["b0"]
    h = _softplus(h.astype(act_dtype))
    h = jnp.dot(h, params["w1"].astype(act_dtype),
                preferred_element_type=jnp.float32) + params["b1"]
    h = _softplus(h.astype(act_dtype))
    o = jnp.dot(h, params["w2"].astype(act_dtype),
                preferred_element_type=jnp.float32) + params["b2"]
    return o.astype(jnp.float32)


if __name__ == "__main__":
    key = jax.random.PRNGKey(0)
    k_x, k_p = jax.random.split(key)

    N = 500                                          # not a tile multiple: tests padding path
    x = jax.random.normal(k_x, (N, IN_DIM), jnp.float32)   # [latent | xyz]
    params = init_params(k_p)

    act_dtype = _act_dtype_for_device()
    out = mlp_forward(x, params, tile=128, act_dtype=act_dtype)
    out = jax.block_until_ready(out)

    ref = mlp_reference(x, params, io_dtype=jnp.bfloat16, act_dtype=act_dtype)
    assert out.shape == (N, 1), out.shape
    assert jnp.allclose(out, ref, atol=2e-2, rtol=2e-2), "mismatch vs reference"

    print("KERNEL_OK")
</pallas_src>

<mosaic_0001>
module attributes {stable_mosaic.version = 11 : i64} {
  func.func @mlp_kernel(%arg0: i32, %arg1: memref<128x32xbf16, #tpu.memory_space<vmem>>, %arg2: memref<32x64xbf16, #tpu.memory_space<vmem>>, %arg3: memref<1x64xf32, #tpu.memory_space<vmem>>, %arg4: memref<64x64xf32, #tpu.memory_space<vmem>>, %arg5: memref<1x64xf32, #tpu.memory_space<vmem>>, %arg6: memref<1x64xf32, #tpu.memory_space<vmem>>, %arg7: memref<1x1xf32, #tpu.memory_space<vmem>>, %arg8: memref<1x128xf32, #tpu.memory_space<vmem>>) attributes {dimension_semantics = [#tpu.dimension_semantics<parallel>], iteration_bounds = array<i64: 4>, scalar_prefetch = 0 : i64, scratch_operands = 0 : i64, tpu.core_type = #tpu.core_type<tc>, window_params = [{transform_indices = @transform_0, window_bounds = array<i64: 128, 32>}, {pipeline_mode = #tpu.pipeline_mode<synchronous>, transform_indices = @transform_1, window_bounds = array<i64: 32, 64>}, {pipeline_mode = #tpu.pipeline_mode<synchronous>, transform_indices = @transform_2, window_bounds = array<i64: 1, 64>}, {pipeline_mode = #tpu.pipeline_mode<synchronous>, transform_indices = @transform_3, window_bounds = array<i64: 64, 64>}, {pipeline_mode = #tpu.pipeline_mode<synchronous>, transform_indices = @transform_4, window_bounds = array<i64: 1, 64>}, {pipeline_mode = #tpu.pipeline_mode<synchronous>, transform_indices = @transform_5, window_bounds = array<i64: 1, 64>}, {pipeline_mode = #tpu.pipeline_mode<synchronous>, transform_indices = @transform_6, window_bounds = array<i64: 1, 1>}, {transform_indices = @transform_7, window_bounds = array<i64: 1, 128>}]} {
    %c0 = arith.constant 0 : index
    %c0_0 = arith.constant 0 : index
    %0 = vector.load %arg1[%c0, %c0_0] : memref<128x32xbf16, #tpu.memory_space<vmem>>, vector<128x32xbf16>
    %c0_1 = arith.constant 0 : index
    %c0_2 = arith.constant 0 : index
    %1 = vector.load %arg2[%c0_1, %c0_2] : memref<32x64xbf16, #tpu.memory_space<vmem>>, vector<32x64xbf16>
    %cst = arith.constant dense<0.000000e+00> : vector<128x64xf32>
    %2 = tpu.matmul %0, %1, %cst {dimension_numbers = #tpu.dot_dimension_numbers<[1], [0], [0], [1], [0, 0, 1, 1], [], []>} : vector<128x32xbf16>, vector<32x64xbf16>, vector<128x64xf32> -> vector<128x64xf32>
    %c0_3 = arith.constant 0 : index
    %c0_4 = arith.constant 0 : index
    %3 = vector.load %arg3[%c0_3, %c0_4] : memref<1x64xf32, #tpu.memory_space<vmem>>, vector<1x64xf32>
    %4 = vector.broadcast %3 : vector<1x64xf32> to vector<128x64xf32>
    %5 = arith.addf %2, %4 : vector<128x64xf32>
    %cst_5 = arith.constant 1.000000e+00 : f32
    %6 = vector.broadcast %cst_5 : f32 to vector<128x64xf32>
    %7 = arith.mulf %6, %5 : vector<128x64xf32>
    %cst_6 = arith.constant 2.000000e+01 : f32
    %8 = vector.broadcast %cst_6 : f32 to vector<128x64xf32>
    %9 = arith.cmpf ogt, %7, %8 : vector<128x64xf32>
    %10 = math.exp %7 : vector<128x64xf32>
    %11 = math.log1p %10 : vector<128x64xf32>
    %cst_7 = arith.constant 1.000000e+00 : f32
    %12 = vector.broadcast %cst_7 : f32 to vector<128x64xf32>
    %13 = arith.divf %11, %12 : vector<128x64xf32>
    %14 = arith.select %9, %5, %13 : vector<128x64xi1>, vector<128x64xf32>
    %c0_8 = arith.constant 0 : index
    %c0_9 = arith.constant 0 : index
    %15 = vector.load %arg4[%c0_8, %c0_9] : memref<64x64xf32, #tpu.memory_space<vmem>>, vector<64x64xf32>
    %cst_10 = arith.constant dense<0.000000e+00> : vector<128x64xf32>
    %16 = tpu.matmul %14, %15, %cst_10 {dimension_numbers = #tpu.dot_dimension_numbers<[1], [0], [0], [1], [0, 0, 1, 1], [], []>} : vector<128x64xf32>, vector<64x64xf32>, vector<128x64xf32> -> vector<128x64xf32>
    %c0_11 = arith.constant 0 : index
    %c0_12 = arith.constant 0 : index
    %17 = vector.load %arg5[%c0_11, %c0_12] : memref<1x64xf32, #tpu.memory_space<vmem>>, vector<1x64xf32>
    %18 = vector.broadcast %17 : vector<1x64xf32> to vector<128x64xf32>
    %19 = arith.addf %16, %18 : vector<128x64xf32>
    %cst_13 = arith.constant 1.000000e+00 : f32
    %20 = vector.broadcast %cst_13 : f32 to vector<128x64xf32>
    %21 = arith.mulf %20, %19 : vector<128x64xf32>
    %cst_14 = arith.constant 2.000000e+01 : f32
    %22 = vector.broadcast %cst_14 : f32 to vector<128x64xf32>
    %23 = arith.cmpf ogt, %21, %22 : vector<128x64xf32>
    %24 = math.exp %21 : vector<128x64xf32>
    %25 = math.log1p %24 : vector<128x64xf32>
    %cst_15 = arith.constant 1.000000e+00 : f32
    %26 = vector.broadcast %cst_15 : f32 to vector<128x64xf32>
    %27 = arith.divf %25, %26 : vector<128x64xf32>
    %28 = arith.select %23, %19, %27 : vector<128x64xi1>, vector<128x64xf32>
    %c0_16 = arith.constant 0 : index
    %c0_17 = arith.constant 0 : index
    %29 = vector.load %arg6[%c0_16, %c0_17] : memref<1x64xf32, #tpu.memory_space<vmem>>, vector<1x64xf32>
    %cst_18 = arith.constant dense<0.000000e+00> : vector<1x128xf32>
    %30 = tpu.matmul %29, %28, %cst_18 {dimension_numbers = #tpu.dot_dimension_numbers<[1], [1], [0], [0], [0, 0, 1, 0], [], []>} : vector<1x64xf32>, vector<128x64xf32>, vector<1x128xf32> -> vector<1x128xf32>
    %c0_19 = arith.constant 0 : index
    %c0_20 = arith.constant 0 : index
    %31 = vector.load %arg7[%c0_19, %c0_20] : memref<1x1xf32, #tpu.memory_space<vmem>>, vector<1x1xf32>
    %32 = vector.broadcast %31 : vector<1x1xf32> to vector<1x128xf32>
    %33 = arith.addf %30, %32 : vector<1x128xf32>
    %c0_21 = arith.constant 0 : index
    %c0_22 = arith.constant 0 : index
    %34 = vector.load %arg8[%c0_21, %c0_22] : memref<1x128xf32, #tpu.memory_space<vmem>>, vector<1x128xf32>
    tpu.vector_store %arg8[%c0_21, %c0_22], %33 {strides = array<i32>} : memref<1x128xf32, #tpu.memory_space<vmem>>, vector<1x128xf32>,
    return
  }
  func.func @transform_0(%arg0: i32) -> (i32, i32) {
    %c0_i32 = arith.constant 0 : i32
    %c0_i32_0 = arith.constant 0 : i32
    return %arg0, %c0_i32 : i32, i32
  }
  func.func @transform_1(%arg0: i32) -> (i32, i32) {
    %c0_i32 = arith.constant 0 : i32
    %c0_i32_0 = arith.constant 0 : i32
    %c0_i32_1 = arith.constant 0 : i32
    return %c0_i32, %c0_i32_0 : i32, i32
  }
  func.func @transform_2(%arg0: i32) -> (i32, i32) {
    %c0_i32 = arith.constant 0 : i32
    %c0_i32_0 = arith.constant 0 : i32
    %c0_i32_1 = arith.constant 0 : i32
    return %c0_i32, %c0_i32_0 : i32, i32
  }
  func.func @transform_3(%arg0: i32) -> (i32, i32) {
    %c0_i32 = arith.constant 0 : i32
    %c0_i32_0 = arith.constant 0 : i32
    %c0_i32_1 = arith.constant 0 : i32
    return %c0_i32, %c0_i32_0 : i32, i32
  }
  func.func @transform_4(%arg0: i32) -> (i32, i32) {
    %c0_i32 = arith.constant 0 : i32
    %c0_i32_0 = arith.constant 0 : i32
    %c0_i32_1 = arith.constant 0 : i32
    return %c0_i32, %c0_i32_0 : i32, i32
  }
  func.func @transform_5(%arg0: i32) -> (i32, i32) {
    %c0_i32 = arith.constant 0 : i32
    %c0_i32_0 = arith.constant 0 : i32
    %c0_i32_1 = arith.constant 0 : i32
    return %c0_i32, %c0_i32_0 : i32, i32
  }
  func.func @transform_6(%arg0: i32) -> (i32, i32) {
    %c0_i32 = arith.constant 0 : i32
    %c0_i32_0 = arith.constant 0 : i32
    %c0_i32_1 = arith.constant 0 : i32
    return %c0_i32, %c0_i32_0 : i32, i32
  }
  func.func @transform_7(%arg0: i32) -> (i32, i32) {
    %c0_i32 = arith.constant 0 : i32
    %c0_i32_0 = arith.constant 0 : i32
    return %c0_i32, %arg0 : i32, i32
  }
}

</mosaic_0001>

<bundles_post_ra>
// kernel: mlp_forward.1
= control target key start
LH: loop header
LB: loop body
LE: loop exit
PB: predicated region body
PF: predicated region fallthrough
CT: control target
= control target key end

     0   :  { %s1411_s26 = smov 0   ;;  %s1917_s0 = inlined_call_operand.vmem [shape: bf16[512,32], index: 0, kind: input, shape index: {}]   ;;  %s1918_s1 = inlined_call_operand.vmem [shape: bf16[32,64], index: 1, kind: input, shape index: {}]   ;;  %s1919_s2 = inlined_call_operand.vmem [shape: f32[1,64], index: 2, kind: input, shape index: {}]   ;;  %s1920_s3 = inlined_call_operand.vmem [shape: f32[64,64], index: 3, kind: input, shape index: {}]   ;;  %s1921_s4 = inlined_call_operand.vmem [shape: f32[1,64], index: 4, kind: input, shape index: {}]   ;;  %s1922_s5 = inlined_call_operand.vmem [shape: f32[1,64], index: 5, kind: input, shape index: {}]   ;;  %s1923_s6 = inlined_call_operand.<no memory space> [shape: f32[1,1], index: 6, kind: input, shape index: {}]   ;;  %s1924_s7 = inlined_call_operand.vmem [shape: f32[1,512], index: 7, kind: output, shape index: {}]  }
   0x1   :  { %v12_v0 = vstv %s1923_s6 }
   0x2   :  { %13 = vst [vmem:[#allocation2] sm:$0x1] %v12_v0 }
   0x3 LB: > { %s1417_s27 = sadd.s32 4294967295, %s1365_s26   ;;  %p1103_p0 = scmp.ge.s32.totalorder %s1365_s26, 1  ;;  %s1365_s26 = sphi %s1411_s26, %s19_s26  }
   0x4   : > { %p240_p1 = scmp.lt.s32.totalorder %s1365_s26, 5 }
   0x6   : > { %p241_p2 = pnand %p1103_p0, %p240_p1 }
   0x7   : > { %s1104_s6 = sshll.u32 (!%p241_p2), %s1417_s27, 4  ;;  %p276_p4 = scmp.lt.s32.totalorder (!%p241_p2), %s1417_s27, 3 }
   0x8   : > { %244 = sbr.rel (%p241_p2) target bundleno = 603 (0x25b), region = 48  ;;  %p271_p3 = scmp.lt.s32.totalorder (!%p241_p2), %s1104_s6, 63 }
   0xd   : > { %v1198_v1 = vld [vmem:[%s1918_s1 + $0x8] sm:$0xff]  ;;  %v1197_v2 = vld [vmem:[%s1918_s1] sm:$0xff]  ;;  %s1958_s6 = smov (!%p271_p3, %s1104_s6), 63  ;;  %vm356_vm0 = vcmask 261120   ;;  %v645_v11 = vld [vmem:[%s1920_s3 + $0x38] sm:$0xff]  ;;  %vm650_vm3 = vcmask 523264  }
   0xe   : > { %387 = vmatpush.bf16.msra.mxu0 %v1198_v1  ;;  %1199 = vmatpush.bf16.msra.mxu2 %v1198_v1  ;;  %s1105_s9 = sshll.u32 %s1958_s6, 2  ;;  %v644_v12 = vld [vmem:[%s1920_s3 + $0x30] sm:$0xff]  ;;  %v643_v13 = vld [vmem:[%s1920_s3 + $0x28] sm:$0xff]  ;;  %v642_v14 = vld [vmem:[%s1920_s3 + $0x20] sm:$0xff]  ;;  %s1960_s27 = smov (!%p276_p4, %s1417_s27), 3 }
   0xf   : > { %1200 = vmatpush.bf16.msra.mxu3 %v1198_v1  ;;  %s274_s12 = scalar_lea.vmem %s1917_s0, %s1105_s9  ;;  %1203 = vmatpush.msra.mxu1 %v645_v11  ;;  %v641_v15 = vld [vmem:[%s1920_s3 + $0x18] sm:$0xff]  ;;  %v640_v16 = vld [vmem:[%s1920_s3 + $0x10] sm:$0xff]  ;;  %v639_v17 = vld [vmem:[%s1920_s3 + $0x8] sm:$0xff]  ;;  %s278_s15 = scalar_lea.vmem %s1924_s7, %s1960_s27 }
  0x10   : > { %v1189_v3 = vld [vmem:[%s274_s12] sm:$0xff]  ;;  %v1192_v4 = vld [vmem:[%s274_s12 + $0x18] sm:$0xff]  ;;  %v1190_v6 = vld [vmem:[%s274_s12 + $0x8] sm:$0xff] }
  0x11   : > { %v1196_v5 = vld [vmem:[%s274_s12 + $0x38] sm:$0xff]  ;;  %v1193_v7 = vld [vmem:[%s274_s12 + $0x20] sm:$0xff]  ;;  %v1191_v8 = vld [vmem:[%s274_s12 + $0x10] sm:$0xff]  ;;  %1205 = vmatpush.msra.mxu1 %v644_v12 }
  0x12   : > { %388 = vmatpush.bf16.msra.mxu0 %v1197_v2  ;;  %1201 = vmatpush.bf16.msra.mxu2 %v1197_v2  ;;  %v1194_v9 = vld [vmem:[%s274_s12 + $0x28] sm:$0xff]  ;;  %v1195_v10 = vld [vmem:[%s274_s12 + $0x30] sm:$0xff]  ;;  %v638_v18 = vld [vmem:[%s1920_s3] sm:$0xff] }
  0x13   : > { %1202 = vmatpush.bf16.msra.mxu3 %v1197_v2  ;;  %1207 = vmatpush.msra.mxu1 %v643_v13  ;;  %v1466_v19 = vld [vmem:[%s1919_s2] ss:$0 sm:$0xff] }
  0x15   : > { %1146 = vmatmul.msk.bf16.vlgmr.msra.gmra.mxu0 %vm356_vm0, %v1189_v3  ;;  %1149 = vmatmul.msk.bf16.vlgmr.msra.gmra.mxu2 %vm356_vm0, %v1192_v4 }
  0x16   : > { %1153 = vmatmul.msk.bf16.vlgmr.msra.gmra.mxu3 %vm356_vm0, %v1196_v5  ;;  %707 = vmatpush.msrb.mxu0 %v645_v11 }
  0x17   : > { %1204 = vmatpush.msrb.mxu3 %v645_v11  ;;  %1209 = vmatpush.msra.mxu1 %v642_v14 }
  0x18   : > { %708 = vmatpush.msrb.mxu0 %v644_v12 }
  0x19   : > { %1206 = vmatpush.msrb.mxu3 %v644_v12  ;;  %1211 = vmatpush.msra.mxu1 %v641_v15 }
  0x1a   : > { %709 = vmatpush.msrb.mxu0 %v643_v13 }
  0x1b   : > { %1208 = vmatpush.msrb.mxu3 %v643_v13  ;;  %1213 = vmatpush.msra.mxu1 %v640_v16 }
  0x1c   : > { %710 = vmatpush.msrb.mxu0 %v642_v14 }
  0x1d   : > { %1210 = vmatpush.msrb.mxu3 %v642_v14  ;;  %1215 = vmatpush.msra.mxu1 %v639_v17 }
  0x1e   : > { %711 = vmatpush.msrb.mxu0 %v641_v15 }
  0x1f   : > { %1212 = vmatpush.msrb.mxu3 %v641_v15  ;;  %1217 = vmatpush.msra.mxu1 %v638_v18 }
  0x20   : > { %712 = vmatpush.msrb.mxu0 %v640_v16 }
  0x21   : > { %1214 = vmatpush.msrb.mxu3 %v640_v16 }
  0x22   : > { %713 = vmatpush.msrb.mxu0 %v639_v17 }
  0x23   : > { %1216 = vmatpush.msrb.mxu3 %v639_v17 }
  0x24   : > { %714 = vmatpush.msrb.mxu0 %v638_v18 }
  0x25   : > { %1147 = vmatmul.msk.bf16.gmra.mxu0 %vm356_vm0, %v1190_v6  ;;  %1150 = vmatmul.msk.bf16.gmra.mxu2 %vm356_vm0, %v1193_v7 }
  0x26   : > { %1218 = vmatpush.msrb.mxu3 %v638_v18 }
  0x35   : > { %1148 = vmatmul.msk.bf16.gmra.mxu0 %vm356_vm0, %v1191_v8  ;;  %1151 = vmatmul.msk.bf16.gmra.mxu2 %vm356_vm0, %v1194_v9 }
  0x45   : > { %1152 = vmatmul.msk.bf16.gmra.mxu2 %vm356_vm0, %v1195_v10 }
  0x92   : > { %v390_v20 = vpop.f32.mrf.mxu0 }
  0x93   : > { %v391_v21 = vadd.f32 %v1466_v19, %v390_v20 }
  0x95   : > { %v446_v22 = vmul.f32 1.442695, %v391_v21  ;;  %vm430_vm2 = vcmp.gt.f32.partialorder %v391_v21, 20.0 }
  0x97   : > { %1231 = vpow2.f32 %v446_v22 }
  0x98   : > { %v405_v23 = vpop.f32.mrf.mxu2 }
  0x99   : > { %v1487_v63 = vadd.f32 %v1466_v19, %v405_v23 }
  0x9a   : > { %v392_v24 = vpop.f32.mrf.mxu0 }
  0x9b   : > { %v393_v25 = vadd.f32 %v1466_v19, %v392_v24  ;;  %v458_v7 = vmul.f32 1.442695, %v1487_v63 }
  0x9d   : > { %v1232_v26 = vpop.eup %1231  ;;  %v448_v27 = vmul.f32 1.442695, %v393_v25  ;;  %vm431_vm5 = vcmp.gt.f32.partialorder %v393_v25, 20.0 }
  0x9e   : > { %v478_v28 = vadd.f32 1.0, %v1232_v26  ;;  %v481_v29 = vmul.f32 -0.5, %v1232_v26  ;;  %v484_v33 = vand.u32 2147483647, %v1232_v26 }
  0x9f   : > { %1233 = vpow2.f32 %v448_v27 }
  0xa0   : > { %v1470_v30 = vpop.f32.mrf.mxu2  ;;  %1235 = vlog2.f32 %v478_v28  ;;  %v482_v31 = vadd.f32 1.0, %v481_v29  ;;  %vm485_vm1 = vcmp.lt.f32.partialorder %v484_v33, 0.0004427343 }
  0xa1   : > { %v1501_v17 = vadd.f32 %v1466_v19, %v1470_v30 }
  0xa2   : > { %v395_v32 = vpop.f32.mrf.mxu0  ;;  %v483_v37 = vmul.f32 %v1232_v26, %v482_v31 }
  0xa3   : > { %v396_v34 = vadd.f32 %v1466_v19, %v395_v32  ;;  %v460_v26 = vmul.f32 1.442695, %v1501_v17 }
  0xa5   : > { %v1234_v35 = vpop.eup %1233  ;;  %v450_v36 = vmul.f32 1.442695, %v396_v34  ;;  %vm432_vm7 = vcmp.gt.f32.partialorder %v396_v34, 20.0 }
  0xa6   : > { %v1236_v38 = vpop.eup %1235  ;;  %v487_v39 = vadd.f32 1.0, %v1234_v35  ;;  %v490_v40 = vmul.f32 -0.5, %v1234_v35  ;;  %v493_v47 = vand.u32 2147483647, %v1234_v35 }
  0xa7   : > { %1237 = vpow2.f32 %v450_v36  ;;  %v480_v41 = vmul.f32 0.6931472, %v1236_v38 }
  0xa8   : > { %v1473_v42 = vpop.f32.mrf.mxu2  ;;  %1239 = vlog2.f32 %v487_v39  ;;  %v491_v44 = vadd.f32 1.0, %v490_v40  ;;  %vm494_vm4 = vcmp.lt.f32.partialorder %v493_v47, 0.0004427343 }
  0xa9   : > { %v486_v43 = vsel %vm485_vm1, %v483_v37, %v480_v41  ;;  %v1516_v36 = vadd.f32 %v1466_v19, %v1473_v42 }
  0xaa   : > { %v397_v45 = vpop.f32.mrf.mxu0  ;;  %v622_v46 = vsel %vm430_vm2, %v391_v21, %v486_v43  ;;  %v492_v51 = vmul.f32 %v1234_v35, %v491_v44  ;;  %v425_v43 = vpop.f32.mrf.mxu3 }
  0xab   : > { %v1476_v48 = vadd.f32 %v1466_v19, %v397_v45  ;;  %1154 = vmatmul.msk.f32.vlgmr.msrb.gmra.mxu0 %vm650_vm3, %v622_v46  ;;  %v1524_v47 = vadd.f32 %v1466_v19, %v425_v43 }
  0xad   : > { %v1238_v49 = vpop.eup %1237  ;;  %v452_v50 = vmul.f32 1.442695, %v1476_v48  ;;  %vm433_vm9 = vcmp.gt.f32.partialorder %v1476_v48, 20.0 }
  0xae   : > { %v1240_v52 = vpop.eup %1239  ;;  %v496_v53 = vadd.f32 1.0, %v1238_v49  ;;  %v499_v54 = vmul.f32 -0.5, %v1238_v49  ;;  %v502_v61 = vand.u32 2147483647, %v1238_v49 }
  0xaf   : > { %1241 = vpow2.f32 %v452_v50  ;;  %v489_v55 = vmul.f32 0.6931472, %v1240_v52 }
  0xb0   : > { %v1480_v56 = vpop.f32.mrf.mxu2  ;;  %1243 = vlog2.f32 %v496_v53  ;;  %v500_v58 = vadd.f32 1.0, %v499_v54  ;;  %vm503_vm6 = vcmp.lt.f32.partialorder %v502_v61, 0.0004427343  ;;  %v474_v61 = vmul.f32 1.442695, %v1524_v47 }
  0xb1   : > { %v495_v57 = vsel %vm494_vm4, %v492_v51, %v489_v55  ;;  %vm436_vm4 = vcmp.gt.f32.partialorder %v1487_v63, 20.0 }
  0xb2   : > { %v400_v59 = vpop.f32.mrf.mxu0  ;;  %v623_v60 = vsel %vm431_vm5, %v393_v25, %v495_v57  ;;  %v501_v2 = vmul.f32 %v1238_v49, %v500_v58  ;;  %v462_v49 = vmul.f32 1.442695, %v1516_v36 }
  0xb3   : > { %v1483_v62 = vadd.f32 %v1466_v19, %v400_v59  ;;  %1155 = vmatmul.msk.f32.gmra.mxu0 %vm650_vm3, %v623_v60 }
  0xb5   : > { %v1242_v0 = vpop.eup %1241  ;;  %v454_v1 = vmul.f32 1.442695, %v1483_v62  ;;  %vm434_vm11 = vcmp.gt.f32.partialorder %v1483_v62, 20.0 }
  0xb6   : > { %v1244_v3 = vpop.eup %1243  ;;  %v505_v4 = vadd.f32 1.0, %v1242_v0  ;;  %v508_v5 = vmul.f32 -0.5, %v1242_v0  ;;  %v511_v14 = vand.u32 2147483647, %v1242_v0 }
  0xb7   : > { %1245 = vpow2.f32 %v454_v1  ;;  %v498_v6 = vmul.f32 0.6931472, %v1244_v3  ;;  %v1542_v3 = vadd.f32 %v1466_v19, %v1480_v56 }
  0xb8   : > { %v415_v8 = vpop.f32.mrf.mxu2  ;;  %1247 = vlog2.f32 %v505_v4  ;;  %v509_v11 = vadd.f32 1.0, %v508_v5  ;;  %vm512_vm8 = vcmp.lt.f32.partialorder %v511_v14, 0.0004427343 }
  0xb9   : > { %v1492_v9 = vadd.f32 %v1466_v19, %v415_v8  ;;  %v504_v10 = vsel %vm503_vm6, %v501_v2, %v498_v6  ;;  %1249 = vpow2.f32 %v458_v7  ;;  %v464_v14 = vmul.f32 1.442695, %v1542_v3 }
  0xba   : > { %v402_v12 = vpop.f32.mrf.mxu0  ;;  %v624_v13 = vsel %vm432_vm7, %v396_v34, %v504_v10  ;;  %v510_v21 = vmul.f32 %v1242_v0, %v509_v11 }
  0xbb   : > { %v466_v15 = vmul.f32 1.442695, %v1492_v9  ;;  %v1496_v16 = vadd.f32 %v1466_v19, %v402_v12  ;;  %1156 = vmatmul.msk.f32.vlgmr.msra.gmra.mxu1 %vm650_vm3, %v624_v13  ;;  %vm440_vm14 = vcmp.gt.f32.partialorder %v1492_v9, 20.0 }
  0xbd   : > { %v1246_v18 = vpop.eup %1245  ;;  %1251 = vpow2.f32 %v466_v15  ;;  %v456_v20 = vmul.f32 1.442695, %v1496_v16  ;;  %vm435_vm15 = vcmp.gt.f32.partialorder %v1496_v16, 20.0  ;;  %v427_v15 = vpop.f32.mrf.mxu3 }
  0xbe   : > { %v1248_v22 = vpop.eup %1247  ;;  %v514_v23 = vadd.f32 1.0, %v1246_v18  ;;  %v517_v24 = vmul.f32 -0.5, %v1246_v18  ;;  %v520_v33 = vand.u32 2147483647, %v1246_v18 }
  0xbf   : > { %1253 = vpow2.f32 %v456_v20  ;;  %v507_v25 = vmul.f32 0.6931472, %v1248_v22  ;;  %v1509_v31 = vpop.eup %1249 }
  0xc0   : > { %v417_v27 = vpop.f32.mrf.mxu2  ;;  %1255 = vlog2.f32 %v514_v23  ;;  %v518_v30 = vadd.f32 1.0, %v517_v24  ;;  %vm1518_vm10 = vcmp.lt.f32.partialorder %v520_v33, 0.0004427343  ;;  %v532_v46 = vadd.f32 1.0, %v1509_v31 }
  0xc1   : > { %v1507_v28 = vadd.f32 %v1466_v19, %v417_v27  ;;  %v513_v29 = vsel %vm512_vm8, %v510_v21, %v507_v25  ;;  %1257 = vpow2.f32 %v460_v26  ;;  %v535_v1 = vmul.f32 -0.5, %v1509_v31 }
  0xc2   : > { %v625_v32 = vsel %vm433_vm9, %v1476_v48, %v513_v29  ;;  %v519_v40 = vmul.f32 %v1246_v18, %v518_v30  ;;  %v538_v29 = vand.u32 2147483647, %v1509_v31  ;;  %vm437_vm8 = vcmp.gt.f32.partialorder %v1501_v17, 20.0 }
  0xc3   : > { %v1252_v34 = vpop.eup %1251  ;;  %v468_v35 = vmul.f32 1.442695, %v1507_v28  ;;  %1157 = vmatmul.msk.f32.gmra.mxu1 %vm650_vm3, %v625_v32  ;;  %v536_v21 = vadd.f32 1.0, %v535_v1  ;;  %vm441_vm2 = vcmp.gt.f32.partialorder %v1507_v28, 20.0 }
  0xc4   : > { %v568_v37 = vadd.f32 1.0, %v1252_v34  ;;  %v571_v38 = vmul.f32 -0.5, %v1252_v34  ;;  %v574_v58 = vand.u32 2147483647, %v1252_v34  ;;  %vm1570_vm1 = vcmp.lt.f32.partialorder %v538_v29, 0.0004427343 }
  0xc5   : > { %v1254_v39 = vpop.eup %1253  ;;  %1259 = vpow2.f32 %v468_v35  ;;  %v537_v35 = vmul.f32 %v1509_v31, %v536_v21 }
  0xc6   : > { %v1256_v41 = vpop.eup %1255  ;;  %1261 = vlog2.f32 %v568_v37  ;;  %v523_v45 = vadd.f32 1.0, %v1254_v39  ;;  %v526_v48 = vmul.f32 -0.5, %v1254_v39  ;;  %v572_v51 = vadd.f32 1.0, %v571_v38 }
  0xc7   : > { %v516_v42 = vmul.f32 0.6931472, %v1256_v41  ;;  %v1533_v55 = vpop.eup %1257  ;;  %v529_v59 = vand.u32 2147483647, %v1254_v39  ;;  %vm575_vm12 = vcmp.lt.f32.partialorder %v574_v58, 0.0004427343 }
  0xc8   : > { %v420_v50 = vpop.f32.mrf.mxu2  ;;  %1263 = vlog2.f32 %v523_v45  ;;  %v527_v54 = vadd.f32 1.0, %v526_v48  ;;  %v573_v4 = vmul.f32 %v1252_v34, %v572_v51  ;;  %v541_v11 = vadd.f32 1.0, %v1533_v55 }
  0xc9   : > { %v1529_v52 = vadd.f32 %v1466_v19, %v420_v50  ;;  %v522_v53 = vsel %vm1518_vm10, %v519_v40, %v516_v42  ;;  %1265 = vlog2.f32 %v532_v46  ;;  %vm1544_vm13 = vcmp.lt.f32.partialorder %v529_v59, 0.0004427343 }
  0xca   : > { %v626_v57 = vsel %vm434_vm11, %v1483_v62, %v522_v53  ;;  %1267 = vpow2.f32 %v462_v49  ;;  %v528_v6 = vmul.f32 %v1254_v39, %v527_v54  ;;  %v547_v54 = vand.u32 2147483647, %v1533_v55 }
  0xcb   : > { %v1260_v60 = vpop.eup %1259  ;;  %v470_v0 = vmul.f32 1.442695, %v1529_v52  ;;  %1158 = vmatmul.msk.f32.gmra.mxu1 %vm650_vm3, %v626_v57  ;;  %vm442_vm7 = vcmp.gt.f32.partialorder %v1529_v52, 20.0 }
  0xcc   : > { %v1262_v2 = vpop.eup %1261  ;;  %v577_v62 = vadd.f32 1.0, %v1260_v60  ;;  %v580_v7 = vmul.f32 -0.5, %v1260_v60  ;;  %v583_v27 = vand.u32 2147483647, %v1260_v60  ;;  %vm1592_vm6 = vcmp.lt.f32.partialorder %v547_v54, 0.0004427343 }
  0xcd   : > { %1269 = vpow2.f32 %v470_v0  ;;  %v570_v5 = vmul.f32 0.6931472, %v1262_v2 }
  0xce   : > { %v1264_v8 = vpop.eup %1263  ;;  %1271 = vlog2.f32 %v577_v62  ;;  %v581_v24 = vadd.f32 1.0, %v580_v7  ;;  %vm584_vm0 = vcmp.lt.f32.partialorder %v583_v27, 0.0004427343 }
  0xcf   : > { %v576_v12 = vsel %vm575_vm12, %v573_v4, %v570_v5  ;;  %v525_v56 = vmul.f32 0.6931472, %v1264_v8  ;;  %v1266_v13 = vpop.eup %1265  ;;  %1273 = vlog2.f32 %v541_v11  ;;  %vm438_vm12 = vcmp.gt.f32.partialorder %v1516_v36, 20.0 }
  0xd0   : > { %v422_v18 = vpop.f32.mrf.mxu2  ;;  %v632_v20 = vsel %vm440_vm14, %v1492_v9, %v576_v12  ;;  %v1559_v25 = vpop.eup %1267  ;;  %1275 = vpow2.f32 %v474_v61  ;;  %v1564_v9 = vadd.f32 %v1466_v19, %v427_v15  ;;  %v534_v33 = vmul.f32 0.6931472, %v1266_v13 }
  0xd1   : > { %v1554_v22 = vadd.f32 %v1466_v19, %v422_v18  ;;  %1164 = vmatmul.msk.f32.vlgmr.msrb.gmra.mxu3 %vm650_vm3, %v632_v20  ;;  %v531_v23 = vsel %vm1544_vm13, %v528_v6, %v525_v56  ;;  %1277 = vpow2.f32 %v464_v14  ;;  %v582_v39 = vmul.f32 %v1260_v60, %v581_v24 }
  0xd2   : > { %v627_v26 = vsel %vm435_vm15, %v1496_v16, %v531_v23  ;;  %v544_v16 = vmul.f32 -0.5, %v1533_v55  ;;  %v550_v41 = vadd.f32 1.0, %v1559_v25  ;;  %v476_v43 = vmul.f32 1.442695, %v1564_v9 }
  0xd3   : > { %v1270_v30 = vpop.eup %1269  ;;  %v472_v32 = vmul.f32 1.442695, %v1554_v22  ;;  %1159 = vmatmul.msk.f32.gmra.mxu1 %vm650_vm3, %v627_v26  ;;  %v540_v44 = vsel %vm1570_vm1, %v537_v35, %v534_v33  ;;  %v553_v60 = vmul.f32 -0.5, %v1559_v25  ;;  %v556_v14 = vand.u32 2147483647, %v1559_v25 }
  0xd4   : > { %v1272_v34 = vpop.eup %1271  ;;  %v586_v37 = vadd.f32 1.0, %v1270_v30  ;;  %v589_v40 = vmul.f32 -0.5, %v1270_v30  ;;  %v545_v49 = vadd.f32 1.0, %v544_v16  ;;  %v628_v51 = vsel %vm436_vm4, %v1487_v63, %v540_v44 }
  0xd5   : > { %1279 = vpow2.f32 %v472_v32  ;;  %v579_v38 = vmul.f32 0.6931472, %v1272_v34  ;;  %v1274_v45 = vpop.eup %1273  ;;  %v592_v53 = vand.u32 2147483647, %v1270_v30  ;;  %v554_v10 = vadd.f32 1.0, %v553_v60 }
  0xd6   : > { %1281 = vlog2.f32 %v586_v37  ;;  %v1580_v42 = vpop.eup %1275  ;;  %v590_v48 = vadd.f32 1.0, %v589_v40  ;;  %v546_v2 = vmul.f32 %v1533_v55, %v545_v49  ;;  %vm557_vm10 = vcmp.lt.f32.partialorder %v556_v14, 0.0004427343 }
  0xd7   : > { %v585_v31 = vsel %vm584_vm0, %v582_v39, %v579_v38  ;;  %v1584_v50 = vpop.eup %1277  ;;  %1283 = vlog2.f32 %v550_v41  ;;  %v604_v61 = vadd.f32 1.0, %v1580_v42  ;;  %vm593_vm5 = vcmp.lt.f32.partialorder %v592_v53, 0.0004427343 }
  0xd8   : > { %v633_v46 = vsel %vm441_vm2, %v1507_v28, %v585_v31  ;;  %1285 = vpow2.f32 %v476_v43  ;;  %v543_v28 = vmul.f32 0.6931472, %v1274_v45  ;;  %v591_v1 = vmul.f32 %v1270_v30, %v590_v48 }
  0xd9   : > { %1165 = vmatmul.msk.f32.gmra.mxu3 %vm650_vm3, %v633_v46  ;;  %v559_v62 = vadd.f32 1.0, %v1584_v50  ;;  %v607_v12 = vmul.f32 -0.5, %v1580_v42  ;;  %v555_v18 = vmul.f32 %v1559_v25, %v554_v10  ;;  %v562_v26 = vmul.f32 -0.5, %v1584_v50 }
  0xda   : > { %v549_v6 = vsel %vm1592_vm6, %v546_v2, %v543_v28  ;;  %vm443_vm11 = vcmp.gt.f32.partialorder %v1554_v22, 20.0  ;;  %v565_v38 = vand.u32 2147483647, %v1584_v50  ;;  %vm444_vm14 = vcmp.gt.f32.partialorder %v1524_v47, 20.0 }
  0xdb   : > { %v1280_v57 = vpop.eup %1279  ;;  %1160 = vmatmul.msk.f32.gmra.mxu1 %vm650_vm3, %v628_v51  ;;  %v629_v56 = vsel %vm437_vm8, %v1501_v17, %v549_v6  ;;  %v608_v24 = vadd.f32 1.0, %v607_v12  ;;  %v610_v17 = vand.u32 2147483647, %v1580_v42  ;;  %v563_v35 = vadd.f32 1.0, %v562_v26 }
  0xdc   : > { %v1282_v58 = vpop.eup %1281  ;;  %v595_v59 = vadd.f32 1.0, %v1280_v57  ;;  %v598_v63 = vmul.f32 -0.5, %v1280_v57  ;;  %v601_v13 = vand.u32 2147483647, %v1280_v57  ;;  %vm566_vm15 = vcmp.lt.f32.partialorder %v565_v38, 0.0004427343 }
  0xdd   : > { %v588_v0 = vmul.f32 0.6931472, %v1282_v58  ;;  %v1284_v7 = vpop.eup %1283  ;;  %v609_v34 = vmul.f32 %v1580_v42, %v608_v24  ;;  %vm611_vm13 = vcmp.lt.f32.partialorder %v610_v17, 0.0004427343  ;;  %v564_v40 = vmul.f32 %v1584_v50, %v563_v35 }
  0xde   : > { %1287 = vlog2.f32 %v595_v59  ;;  %v1286_v55 = vpop.eup %1285  ;;  %v599_v11 = vadd.f32 1.0, %v598_v63  ;;  %v552_v15 = vmul.f32 0.6931472, %v1284_v7  ;;  %vm602_vm9 = vcmp.lt.f32.partialorder %v601_v13, 0.0004427343 }
  0xdf   : > { %v594_v5 = vsel %vm593_vm5, %v591_v1, %v588_v0  ;;  %1289 = vlog2.f32 %v604_v61  ;;  %v613_v20 = vadd.f32 1.0, %v1286_v55  ;;  %v616_v37 = vmul.f32 -0.5, %v1286_v55 }
  0xe0   : > { %v634_v8 = vsel %vm442_vm7, %v1529_v52, %v594_v5  ;;  %1291 = vlog2.f32 %v559_v62  ;;  %v600_v23 = vmul.f32 %v1280_v57, %v599_v11  ;;  %v558_v30 = vsel %vm557_vm10, %v555_v18, %v552_v15 }
  0xe1   : > { %1166 = vmatmul.msk.f32.gmra.mxu3 %vm650_vm3, %v634_v8  ;;  %1293 = vlog2.f32 %v613_v20  ;;  %v630_v16 = vsel %vm438_vm12, %v1516_v36, %v558_v30  ;;  %v617_v19 = vadd.f32 1.0, %v616_v37  ;;  %v619_v43 = vand.u32 2147483647, %v1286_v55 }
  0xe2   : > { %vm439_vm0 = vcmp.gt.f32.partialorder %v1542_v3, 20.0  ;;  %vm445_vm2 = vcmp.gt.f32.partialorder %v1564_v9, 20.0 }
  0xe3   : > { %1161 = vmatmul.msk.f32.gmra.mxu1 %vm650_vm3, %v629_v56  ;;  %v618_v45 = vmul.f32 %v1286_v55, %v617_v19  ;;  %vm620_vm1 = vcmp.lt.f32.partialorder %v619_v43, 0.0004427343 }
  0xe4   : > { %v1288_v52 = vpop.eup %1287 }
  0xe5   : > { %v597_v21 = vmul.f32 0.6931472, %v1288_v52  ;;  %v1290_v27 = vpop.eup %1289 }
  0xe6   : > { %v1292_v32 = vpop.eup %1291  ;;  %v606_v25 = vmul.f32 0.6931472, %v1290_v27 }
  0xe7   : > { %v603_v29 = vsel %vm602_vm9, %v600_v23, %v597_v21  ;;  %v561_v39 = vmul.f32 0.6931472, %v1292_v32  ;;  %v1294_v41 = vpop.eup %1293 }
  0xe8   : > { %v635_v33 = vsel %vm443_vm11, %v1554_v22, %v603_v29  ;;  %v612_v22 = vsel %vm611_vm13, %v609_v34, %v606_v25  ;;  %v615_v36 = vmul.f32 0.6931472, %v1294_v41 }
  0xe9   : > { %1167 = vmatmul.msk.f32.gmra.mxu3 %vm650_vm3, %v635_v33  ;;  %v567_v31 = vsel %vm566_vm15, %v564_v40, %v561_v39  ;;  %v636_v44 = vsel %vm444_vm14, %v1524_v47, %v612_v22 }
  0xea   : > { %v631_v46 = vsel %vm439_vm0, %v1542_v3, %v567_v31  ;;  %v621_v42 = vsel %vm620_vm1, %v618_v45, %v615_v36 }
  0xeb   : > { %1162 = vmatmul.msk.f32.gmra.mxu1 %vm650_vm3, %v630_v16  ;;  %v637_v48 = vsel %vm445_vm2, %v1564_v9, %v621_v42  ;;  %v1639_v9 = vld [vmem:[%s1921_s4] ss:$0 sm:$0xff] }
  0xf1   : > { %1168 = vmatmul.msk.f32.gmra.mxu3 %vm650_vm3, %v636_v44 }
  0xf3   : > { %1163 = vmatmul.msk.f32.gmra.mxu1 %vm650_vm3, %v631_v46 }
  0xf9   : > { %1169 = vmatmul.msk.f32.gmra.mxu3 %vm650_vm3, %v637_v48 }
 0x138   : > { %v1628_v49 = vpop.f32.mrf.mxu1 }
 0x140   : > { %v1630_v47 = vpop.f32.mrf.mxu1 }
 0x148   : > { %v1632_v50 = vpop.f32.mrf.mxu1 }
 0x150   : > { %v1634_v53 = vpop.f32.mrf.mxu1 }
 0x154   : > { %v746_v51 = vpop.f32.mrf.mxu3 }
 0x155   : > { %v1654_v5 = vadd.f32 %v1639_v9, %v746_v51 }
 0x157   : > { %v800_v55 = vmul.f32 1.442695, %v1654_v5  ;;  %vm774_vm15 = vcmp.gt.f32.partialorder %v1654_v5, 20.0 }
 0x158   : > { %v734_v57 = vpop.f32.mrf.mxu1 }
 0x159   : > { %v1685_v38 = vadd.f32 %v1639_v9, %v734_v57 }
 0x15c   : > { %v749_v3 = vpop.f32.mrf.mxu3 }
 0x15d   : > { %v1657_v6 = vadd.f32 %v1639_v9, %v749_v3 }
 0x15f   : > { %v802_v11 = vmul.f32 1.442695, %v1657_v6  ;;  %vm775_vm13 = vcmp.gt.f32.partialorder %v1657_v6, 20.0 }
 0x160   : > { %v737_v58 = vpop.f32.mrf.mxu1 }
 0x161   : > { %v1680_v33 = vadd.f32 %v1639_v9, %v737_v58 }
 0x163   : > { %v794_v44 = vmul.f32 1.442695, %v1680_v33 }
 0x164   : > { %v752_v54 = vpop.f32.mrf.mxu3 }
 0x165   : > { %v1649_v2 = vadd.f32 %v1639_v9, %v752_v54 }
 0x167   : > { %v804_v7 = vmul.f32 1.442695, %v1649_v2  ;;  %vm776_vm11 = vcmp.gt.f32.partialorder %v1649_v2, 20.0 }
 0x168   : > { %v740_v1 = vpop.f32.mrf.mxu1 }
 0x169   : > { %v1671_v23 = vadd.f32 %v1639_v9, %v740_v1 }
 0x16b   : > { %v796_v25 = vmul.f32 1.442695, %v1671_v23 }
 0x16c   : > { %v755_v28 = vpop.f32.mrf.mxu3 }
 0x16d   : > { %v1645_v61 = vadd.f32 %v1639_v9, %v755_v28 }
 0x16f   : > { %v806_v63 = vmul.f32 1.442695, %v1645_v61  ;;  %vm777_vm9 = vcmp.gt.f32.partialorder %v1645_v61, 20.0 }
 0x170   : > { %v743_v12 = vpop.f32.mrf.mxu1 }
 0x171   : > { %v1665_v15 = vadd.f32 %v1639_v9, %v743_v12 }
 0x173   : > { %v798_v24 = vmul.f32 1.442695, %v1665_v15  ;;  %vm773_vm1 = vcmp.gt.f32.partialorder %v1665_v15, 20.0 }
 0x174   : > { %v758_v59 = vpop.f32.mrf.mxu3 }
 0x175   : > { %v1642_v60 = vadd.f32 %v1639_v9, %v758_v59  ;;  %v1703_v59 = vadd.f32 %v1639_v9, %v1634_v53 }
 0x177   : > { %v808_v0 = vmul.f32 1.442695, %v1642_v60  ;;  %vm778_vm7 = vcmp.gt.f32.partialorder %v1642_v60, 20.0 }
 0x179   : > { %1295 = vpow2.f32 %v808_v0  ;;  %v792_v0 = vmul.f32 1.442695, %v1685_v38 }
 0x17a   : > { %1297 = vpow2.f32 %v806_v63 }
 0x17c   : > { %v761_v4 = vpop.f32.mrf.mxu3 }
 0x17d   : > { %v762_v62 = vadd.f32 %v1639_v9, %v761_v4 }
 0x17f   : > { %v810_v8 = vmul.f32 1.442695, %v762_v62  ;;  %v1296_v10 = vpop.eup %1295  ;;  %vm779_vm5 = vcmp.gt.f32.partialorder %v762_v62, 20.0 }
 0x180   : > { %v938_v56 = vadd.f32 1.0, %v1296_v10  ;;  %v1662_v13 = vpop.eup %1297  ;;  %v941_v26 = vmul.f32 -0.5, %v1296_v10  ;;  %v944_v39 = vand.u32 2147483647, %v1296_v10 }
 0x181   : > { %1299 = vpow2.f32 %v810_v8  ;;  %v929_v18 = vadd.f32 1.0, %v1662_v13  ;;  %v932_v37 = vmul.f32 -0.5, %v1662_v13  ;;  %v935_v3 = vand.u32 2147483647, %v1662_v13 }
 0x182   : > { %1301 = vpow2.f32 %v804_v7  ;;  %v942_v35 = vadd.f32 1.0, %v941_v26  ;;  %vm1691_vm6 = vcmp.lt.f32.partialorder %v944_v39, 0.0004427343 }
 0x183   : > { %1303 = vpow2.f32 %v800_v55  ;;  %v933_v42 = vadd.f32 1.0, %v932_v37  ;;  %vm1712_vm8 = vcmp.lt.f32.partialorder %v935_v3, 0.0004427343  ;;  %v1718_v55 = vpop.f32.mrf.mxu0 }
 0x184   : > { %1305 = vpow2.f32 %v802_v11  ;;  %v943_v46 = vmul.f32 %v1296_v10, %v942_v35  ;;  %v1722_v11 = vadd.f32 %v1639_v9, %v1632_v50 }
 0x185   : > { %1307 = vlog2.f32 %v938_v56  ;;  %v934_v1 = vmul.f32 %v1662_v13, %v933_v42  ;;  %v790_v13 = vmul.f32 1.442695, %v1703_v59 }
 0x187   : > { %v1300_v14 = vpop.eup %1299 }
 0x188   : > { %v947_v52 = vadd.f32 1.0, %v1300_v14  ;;  %v1668_v20 = vpop.eup %1301  ;;  %v950_v21 = vmul.f32 -0.5, %v1300_v14  ;;  %v953_v34 = vand.u32 2147483647, %v1300_v14 }
 0x189   : > { %v1674_v27 = vpop.eup %1303  ;;  %v920_v17 = vadd.f32 1.0, %v1668_v20  ;;  %v923_v36 = vmul.f32 -0.5, %v1668_v20  ;;  %v926_v53 = vand.u32 2147483647, %v1668_v20 }
 0x18a   : > { %1309 = vlog2.f32 %v947_v52  ;;  %v1677_v29 = vpop.eup %1305  ;;  %v951_v30 = vadd.f32 1.0, %v950_v21  ;;  %v902_v43 = vadd.f32 1.0, %v1674_v27  ;;  %vm954_vm4 = vcmp.lt.f32.partialorder %v953_v34, 0.0004427343 }
 0x18b   : > { %1311 = vlog2.f32 %v929_v18  ;;  %v1308_v32 = vpop.eup %1307  ;;  %v911_v22 = vadd.f32 1.0, %v1677_v29  ;;  %v924_v63 = vadd.f32 1.0, %v923_v36  ;;  %v914_v4 = vmul.f32 -0.5, %v1677_v29 }
 0x18c   : > { %1313 = vpow2.f32 %v798_v24  ;;  %v952_v19 = vmul.f32 %v1300_v14, %v951_v30  ;;  %v940_v41 = vmul.f32 0.6931472, %v1308_v32  ;;  %v905_v14 = vmul.f32 -0.5, %v1674_v27 }
 0x18d   : > { %1315 = vlog2.f32 %v920_v17  ;;  %v925_v18 = vmul.f32 %v1668_v20, %v924_v63  ;;  %v915_v21 = vadd.f32 1.0, %v914_v4  ;;  %v917_v50 = vand.u32 2147483647, %v1677_v29 }
 0x18e   : > { %1317 = vpow2.f32 %v796_v25  ;;  %v946_v57 = vsel %vm1691_vm6, %v943_v46, %v940_v41  ;;  %vm1735_vm10 = vcmp.lt.f32.partialorder %v926_v53, 0.0004427343  ;;  %v1742_v32 = vadd.f32 %v1639_v9, %v1630_v47 }
 0x18f   : > { %1319 = vlog2.f32 %v911_v22  ;;  %v970_v7 = vsel %vm778_vm7, %v1642_v60, %v946_v57  ;;  %v788_v20 = vmul.f32 1.442695, %v1722_v11  ;;  %v916_v35 = vmul.f32 %v1677_v29, %v915_v21 }
 0x190   : > { %v1310_v16 = vpop.eup %1309  ;;  %1321 = vlog2.f32 %v902_v43  ;;  %v906_v37 = vadd.f32 1.0, %v905_v14  ;;  %vm1755_vm12 = vcmp.lt.f32.partialorder %v917_v50, 0.0004427343  ;;  %vm771_vm6 = vcmp.gt.f32.partialorder %v1680_v33, 20.0 }
 0x191   : > { %v949_v40 = vmul.f32 0.6931472, %v1310_v16  ;;  %v1312_v31 = vpop.eup %1311  ;;  %1323 = vpow2.f32 %v794_v44 }
 0x192   : > { %v1696_v54 = vpop.eup %1313  ;;  %v931_v28 = vmul.f32 0.6931472, %v1312_v31  ;;  %1325 = vpow2.f32 %v792_v0  ;;  %v719_v31 = vpop.f32.mrf.mxu0  ;;  %v907_v44 = vmul.f32 %v1674_v27, %v906_v37 }
 0x193   : > { %v955_v45 = vsel %vm954_vm4, %v952_v19, %v949_v40  ;;  %v1316_v58 = vpop.eup %1315  ;;  %v893_v10 = vadd.f32 1.0, %v1696_v54  ;;  %v896_v16 = vmul.f32 -0.5, %v1696_v54  ;;  %v786_v19 = vmul.f32 1.442695, %v1742_v32 }
 0x194   : > { %v971_v48 = vsel %vm779_vm5, %v762_v62, %v955_v45  ;;  %v1709_v62 = vpop.eup %1317  ;;  %v937_v12 = vsel %vm1712_vm8, %v934_v1, %v931_v28  ;;  %v922_v60 = vmul.f32 0.6931472, %v1316_v58  ;;  %v899_v51 = vand.u32 2147483647, %v1696_v54 }
 0x195   : > { %1170 = vmatpush.xpose.msk.msrb.mxu2 %vm650_vm3, %v971_v48  ;;  %v1320_v56 = vpop.eup %1319  ;;  %v969_v26 = vsel %vm777_vm9, %v1645_v61, %v937_v12  ;;  %1327 = vlog2.f32 %v893_v10  ;;  %v884_v30 = vadd.f32 1.0, %v1709_v62  ;;  %v908_v61 = vand.u32 2147483647, %v1674_v27 }
 0x196   : > { %v1322_v52 = vpop.eup %1321  ;;  %v928_v25 = vsel %vm1735_vm10, %v925_v18, %v922_v60  ;;  %v913_v34 = vmul.f32 0.6931472, %v1320_v56  ;;  %1329 = vpow2.f32 %v790_v13  ;;  %v897_v45 = vadd.f32 1.0, %v896_v16 }
 0x197   : > { %v1732_v24 = vpop.eup %1323  ;;  %v968_v39 = vsel %vm776_vm11, %v1649_v2, %v928_v25  ;;  %1331 = vlog2.f32 %v884_v30  ;;  %v904_v41 = vmul.f32 0.6931472, %v1322_v52  ;;  %v1766_v2 = vadd.f32 %v1639_v9, %v1628_v49 }
 0x198   : > { %v1752_v47 = vpop.eup %1325  ;;  %v875_v40 = vadd.f32 1.0, %v1732_v24  ;;  %1333 = vpow2.f32 %v788_v20  ;;  %v919_v29 = vsel %vm1755_vm12, %v916_v35, %v913_v34  ;;  %vm1770_vm14 = vcmp.lt.f32.partialorder %v908_v61, 0.0004427343 }
 0x199   : > { %1171 = vmatpush.xpose.msk.msrb.mxu2 %vm650_vm3, %v970_v7  ;;  %v887_v46 = vmul.f32 -0.5, %v1709_v62  ;;  %v967_v48 = vsel %vm775_vm13, %v1657_v6, %v919_v29  ;;  %v866_v49 = vadd.f32 1.0, %v1752_v47  ;;  %v910_v27 = vsel %vm1770_vm14, %v907_v44, %v904_v41  ;;  %v973_v44 = vld [vmem:[#allocation2] sm:$0x1] }
 0x19a   : > { %1335 = vlog2.f32 %v875_v40  ;;  %v1784_v28 = vadd.f32 %v1639_v9, %v719_v31  ;;  %v784_v58 = vmul.f32 1.442695, %v1766_v2  ;;  %v898_v0 = vmul.f32 %v1696_v54, %v897_v45 }
 0x19b   : > { %v1328_v43 = vpop.eup %1327  ;;  %1337 = vpow2.f32 %v786_v19  ;;  %v888_v1 = vadd.f32 1.0, %v887_v46  ;;  %v878_v63 = vmul.f32 -0.5, %v1732_v24  ;;  %v966_v7 = vsel %vm774_vm15, %v1654_v5, %v910_v27 }
 0x19c   : > { %v1775_v42 = vpop.eup %1329  ;;  %v895_v3 = vmul.f32 0.6931472, %v1328_v43  ;;  %vm1794_vm0 = vcmp.lt.f32.partialorder %v899_v51, 0.0004427343  ;;  %v890_v53 = vand.u32 2147483647, %v1709_v62  ;;  %1339 = vlog2.f32 %v866_v49 }
 0x19d   : > { %1172 = vmatpush.xpose.msk.msrb.mxu2 %vm650_vm3, %v969_v26  ;;  %v1332_v57 = vpop.eup %1331  ;;  %v857_v4 = vadd.f32 1.0, %v1775_v42  ;;  %v1804_v60 = vadd.f32 %v1639_v9, %v1718_v55  ;;  %v782_v5 = vmul.f32 1.442695, %v1784_v28  ;;  %1341 = vpow2.f32 %v784_v58 }
 0x19e   : > { %v1788_v6 = vpop.eup %1333  ;;  %v901_v10 = vsel %vm1794_vm0, %v898_v0, %v895_v3  ;;  %v886_v54 = vmul.f32 0.6931472, %v1332_v57  ;;  %v889_v14 = vmul.f32 %v1709_v62, %v888_v1  ;;  %v879_v52 = vadd.f32 1.0, %v878_v63 }
 0x19f   : > { %v848_v56 = vadd.f32 1.0, %v1788_v6  ;;  %v869_v18 = vmul.f32 -0.5, %v1752_v47  ;;  %v965_v21 = vsel %vm773_vm1, %v1665_v15, %v901_v10  ;;  %vm1814_vm2 = vcmp.lt.f32.partialorder %v890_v53, 0.0004427343 }
 0x1a0   : > { %v1336_v12 = vpop.eup %1335  ;;  %v881_v9 = vand.u32 2147483647, %v1732_v24  ;;  %1343 = vlog2.f32 %v857_v4  ;;  %v892_v55 = vsel %vm1814_vm2, %v889_v14, %v886_v54  ;;  %v780_v62 = vmul.f32 1.442695, %v1804_v60 }
 0x1a1   : > { %1173 = vmatpush.xpose.msk.msrb.mxu2 %vm650_vm3, %v968_v39  ;;  %v1808_v13 = vpop.eup %1337  ;;  %v877_v26 = vmul.f32 0.6931472, %v1336_v12  ;;  %1345 = vpow2.f32 %v782_v5  ;;  %vm772_vm4 = vcmp.gt.f32.partialorder %v1671_v23, 20.0  ;;  %v880_v15 = vmul.f32 %v1732_v24, %v879_v52 }
 0x1a2   : > { %v1340_v17 = vpop.eup %1339  ;;  %v839_v30 = vadd.f32 1.0, %v1808_v13  ;;  %v870_v20 = vadd.f32 1.0, %v869_v18  ;;  %v860_v25 = vmul.f32 -0.5, %v1775_v42  ;;  %v964_v61 = vsel %vm772_vm4, %v1671_v23, %v892_v55 }
 0x1a3   : > { %v1827_v34 = vpop.eup %1341  ;;  %vm1830_vm5 = vcmp.lt.f32.partialorder %v881_v9, 0.0004427343  ;;  %v872_v37 = vand.u32 2147483647, %v1752_v47  ;;  %1347 = vlog2.f32 %v848_v56  ;;  %v868_v24 = vmul.f32 0.6931472, %v1340_v17 }
 0x1a4   : > { %v883_v16 = vsel %vm1830_vm5, %v880_v15, %v877_v26  ;;  %v851_v39 = vmul.f32 -0.5, %v1788_v6  ;;  %1349 = vpow2.f32 %v780_v62  ;;  %v863_v40 = vand.u32 2147483647, %v1775_v42 }
 0x1a5   : > { %1174 = vmatpush.xpose.msk.msrb.mxu2 %vm650_vm3, %v967_v48  ;;  %v871_v23 = vmul.f32 %v1752_v47, %v870_v20  ;;  %v861_v19 = vadd.f32 1.0, %v860_v25  ;;  %v830_v29 = vadd.f32 1.0, %v1827_v34  ;;  %v963_v43 = vsel %vm771_vm6, %v1680_v33, %v883_v16 }
 0x1a6   : > { %v1344_v22 = vpop.eup %1343  ;;  %vm1846_vm7 = vcmp.lt.f32.partialorder %v872_v37, 0.0004427343  ;;  %1351 = vlog2.f32 %v839_v30  ;;  %v852_v47 = vadd.f32 1.0, %v851_v39  ;;  %v1367_v46 = vmov 0  }
 0x1a7   : > { %v1843_v41 = vpop.eup %1345  ;;  %v874_v36 = vsel %vm1846_vm7, %v871_v23, %v868_v24  ;;  %v859_v45 = vmul.f32 0.6931472, %v1344_v22  ;;  %1228 = vset.pattern.permute.xlu0 %v1367_v46  ;;  %vm1853_vm8 = vcmp.lt.f32.partialorder %v863_v40, 0.0004427343  ;;  %v854_v33 = vand.u32 2147483647, %v1788_v6 }
 0x1a8   : > { %976 = vperm.xlu0 %1228, %v973_v44   ;;  %vm770_vm9 = vcmp.gt.f32.partialorder %v1685_v38, 20.0  ;;  %v862_v49 = vmul.f32 %v1775_v42, %v861_v19  ;;  %v842_v27 = vmul.f32 -0.5, %v1808_v13  ;;  %1353 = vlog2.f32 %v830_v29 }
 0x1a9   : > { %1175 = vmatpush.xpose.msk.msrb.mxu2 %vm650_vm3, %v966_v7  ;;  %v1348_v48 = vpop.eup %1347  ;;  %v962_v57 = vsel %vm770_vm9, %v1685_v38, %v874_v36  ;;  %v821_v58 = vadd.f32 1.0, %v1843_v41  ;;  %v853_v63 = vmul.f32 %v1788_v6, %v852_v47  ;;  %v833_v4 = vmul.f32 -0.5, %v1827_v34 }
 0x1aa   : > { %v1350_v3 = vpop.eup %1349  ;;  %v865_v0 = vsel %vm1853_vm8, %v862_v49, %v859_v45  ;;  %v850_v1 = vmul.f32 0.6931472, %v1348_v48  ;;  %vm1868_vm10 = vcmp.lt.f32.partialorder %v854_v33, 0.0004427343  ;;  %v845_v38 = vand.u32 2147483647, %v1808_v13 }
 0x1ab   : > { %vm769_vm11 = vcmp.gt.f32.partialorder %v1703_v59, 20.0  ;;  %v843_v8 = vadd.f32 1.0, %v842_v27  ;;  %1355 = vlog2.f32 %v821_v58  ;;  %v812_v10 = vadd.f32 1.0, %v1350_v3 }
 0x1ac   : > { %v1352_v7 = vpop.eup %1351  ;;  %v961_v53 = vsel %vm769_vm11, %v1703_v59, %v865_v0  ;;  %v856_v6 = vsel %vm1868_vm10, %v853_v63, %v850_v1  ;;  %v834_v12 = vadd.f32 1.0, %v833_v4  ;;  %vm1878_vm12 = vcmp.lt.f32.partialorder %v845_v38, 0.0004427343 }
 0x1ad   : > { %1176 = vmatpush.xpose.msk.msrb.mxu2 %vm650_vm3, %v965_v21  ;;  %v841_v54 = vmul.f32 0.6931472, %v1352_v7  ;;  %v836_v14 = vand.u32 2147483647, %v1827_v34  ;;  %vm768_vm13 = vcmp.gt.f32.partialorder %v1722_v11, 20.0  ;;  %v844_v59 = vmul.f32 %v1808_v13, %v843_v8 }
 0x1ae   : > { %v1354_v5 = vpop.eup %1353  ;;  %v824_v52 = vmul.f32 -0.5, %v1843_v41  ;;  %v960_v18 = vsel %vm768_vm13, %v1722_v11, %v856_v6  ;;  %1357 = vlog2.f32 %v812_v10  ;;  %v835_v9 = vmul.f32 %v1827_v34, %v834_v12 }
 0x1af   : > { %v847_v21 = vsel %vm1878_vm12, %v844_v59, %v841_v54  ;;  %v832_v50 = vmul.f32 0.6931472, %v1354_v5  ;;  %v815_v55 = vmul.f32 -0.5, %v1350_v3  ;;  %vm837_vm14 = vcmp.lt.f32.partialorder %v836_v14, 0.0004427343 }
 0x1b0   : > { %v827_v17 = vand.u32 2147483647, %v1843_v41  ;;  %vm767_vm15 = vcmp.gt.f32.partialorder %v1742_v32, 20.0  ;;  %v825_v13 = vadd.f32 1.0, %v824_v52  ;;  %v818_v25 = vand.u32 2147483647, %v1350_v3 }
 0x1b1   : > { %1177 = vmatpush.xpose.msk.msrb.mxu2 %vm650_vm3, %v964_v61  ;;  %v1356_v26 = vpop.eup %1355  ;;  %v959_v62 = vsel %vm767_vm15, %v1742_v32, %v847_v21  ;;  %v838_v11 = vsel %vm837_vm14, %v835_v9, %v832_v50  ;;  %v816_v15 = vadd.f32 1.0, %v815_v55  ;;  %vm766_vm1 = vcmp.gt.f32.partialorder %v1766_v2, 20.0 }
 0x1b2   : > { %v823_v30 = vmul.f32 0.6931472, %v1356_v26  ;;  %vm828_vm0 = vcmp.lt.f32.partialorder %v827_v17, 0.0004427343  ;;  %v826_v34 = vmul.f32 %v1843_v41, %v825_v13  ;;  %v958_v61 = vsel %vm766_vm1, %v1766_v2, %v838_v11  ;;  %v972_v2 = vld [vmem:[%s1922_s5] sm:$0x1] }
 0x1b3   : > { %v817_v37 = vmul.f32 %v1350_v3, %v816_v15  ;;  %vm819_vm2 = vcmp.lt.f32.partialorder %v818_v25, 0.0004427343  ;;  %vm765_vm4 = vcmp.gt.f32.partialorder %v1784_v28, 20.0  ;;  %vm764_vm5 = vcmp.gt.f32.partialorder %v1804_v60, 20.0 }
 0x1b4   : > { %v1358_v20 = vpop.eup %1357  ;;  %v829_v35 = vsel %vm828_vm0, %v826_v34, %v823_v30 }
 0x1b5   : > { %1178 = vmatpush.xpose.msk.msrb.mxu2 %vm650_vm3, %v963_v43  ;;  %v814_v32 = vmul.f32 0.6931472, %v1358_v20  ;;  %v957_v16 = vsel %vm765_vm4, %v1784_v28, %v829_v35 }
 0x1b7   : > { %v820_v24 = vsel %vm819_vm2, %v817_v37, %v814_v32 }
 0x1b8   : > { %v956_v39 = vsel %vm764_vm5, %v1804_v60, %v820_v24 }
 0x1b9   : > { %1179 = vmatpush.xpose.msk.msrb.mxu2 %vm650_vm3, %v962_v57 }
 0x1bd   : > { %1180 = vmatpush.xpose.msk.msrb.mxu2 %vm650_vm3, %v961_v53 }
 0x1c1   : > { %1181 = vmatpush.xpose.msk.msrb.mxu2 %vm650_vm3, %v960_v18 }
 0x1c5   : > { %1182 = vmatpush.xpose.msk.msrb.mxu2 %vm650_vm3, %v959_v62 }
 0x1c9   : > { %1183 = vmatpush.xpose.msk.msrb.mxu2 %vm650_vm3, %v958_v61 }
 0x1cd   : > { %1184 = vmatpush.xpose.msk.msrb.mxu2 %vm650_vm3, %v957_v16 }
 0x1d1   : > { %1185 = vmatpush.xpose.msk.msrb.mxu2 %vm650_vm3, %v956_v39 }
 0x1d4   : > { %1186 = vmatmul.msk.f32.vlgmr.msrb.gmra.mxu2 %vm650_vm3, %v972_v2 }
 0x21a   : > { %v977_v22 = vpop.permute.xlu0 %976 }
 0x21b   : > { %v979_v40 = vperm.slane %v977_v22, 0 }
 0x257   : > { %v1048_v28 = vpop.f32.mrf.mxu2 }
 0x258   : > { %v1049_v23 = vadd.f32 %v1048_v28, %v979_v40 }
 0x25a   : > { %1051 = vst [vmem:[%s278_s15] sm:$0x1] %v1049_v23 }
 0x25b PF: > { %s19_s26 = sadd.s32 1, %s1365_s26  }
 0x25c   : > { %p16_p5 = scmp.ge.s32.totalorder %s19_s26, 6  }
 0x25e   :  { %18 = sbr.rel (!%p16_p5) target bundleno = 3 (0x3), region = 78 }

</bundles_post_ra>
